<compile_context>
chip_gen: v7x
topology: tpu7x:2x2x1
jax: 0.10.0
libtpu: 0.0.40
codegen_flags: <defaults>
</compile_context>

<pallas_src>
import functools

import jax
import jax.numpy as jnp
from jax.experimental import pallas as pl
from jax.experimental.pallas import tpu as pltpu


def _round_up(x, m):
    return (x + m - 1) // m * m


def _vmem_capacity_bytes():
    """Physical VMEM of the local TPU (128 MiB v5e/v6e, 64 MiB v7x); safe fallback."""
    try:
        info = pltpu.get_tpu_info()
        cap = int(getattr(info, "vmem_capacity_bytes"))
        if cap > 0:
            return cap
    except Exception:
        pass
    return 128 << 20


# ---------------------------------------------------------------------------
# Kernels
# ---------------------------------------------------------------------------
def _mlp_chunk(x_ref, w1_ref, b1_ref, w2_ref):
    """relu(x @ W1_chunk + b1_chunk) @ W2_chunk with f32 accumulation on the MXU."""
    k = pl.program_id(1)
    h = jnp.dot(x_ref[...], w1_ref[...], preferred_element_type=jnp.float32)  # (tm, th)
    h = jnp.maximum(h + b1_ref[pl.ds(k, 1), :], 0.0)                           # bias + ReLU (VPU)
    return jnp.dot(h.astype(w2_ref.dtype), w2_ref[...],
                   preferred_element_type=jnp.float32)                         # (tm, E) f32


def _expert_kernel_direct(x_ref, w1_ref, b1_ref, w2_ref, b2_ref, o_ref):
    """f32 output: accumulate straight into the resident output block (no scratch)."""
    k = pl.program_id(1)

    @pl.when(k == 0)
    def _():
        o_ref[...] = jnp.zeros_like(o_ref)

    o_ref[...] += _mlp_chunk(x_ref, w1_ref, b1_ref, w2_ref)

    @pl.when(k == pl.num_programs(1) - 1)
    def _():
        o_ref[...] += b2_ref[...]
    # TODO(synk): nn.Dropout(0.1) is stochastic and disabled at eval time; identity here.


def _expert_kernel_scratch(x_ref, w1_ref, b1_ref, w2_ref, b2_ref, o_ref, acc_ref):
    """Non-f32 output: f32 VMEM accumulator, single finalize cast at the last k."""
    k = pl.program_id(1)

    @pl.when(k == 0)
    def _():
        acc_ref[...] = jnp.zeros_like(acc_ref)

    acc_ref[...] += _mlp_chunk(x_ref, w1_ref, b1_ref, w2_ref)

    @pl.when(k == pl.num_programs(1) - 1)
    def _():
        o_ref[...] = (acc_ref[...] + b2_ref[...]).astype(o_ref.dtype)


# ---------------------------------------------------------------------------
# Wrapper
# ---------------------------------------------------------------------------
@functools.partial(jax.jit, static_argnames=("block_m", "block_h", "compute_dtype"))
def expert_forward(x, w1, b1, w2, b2, *, block_m=None, block_h=None,
                   compute_dtype=jnp.bfloat16):
    """x: (..., E) -> (..., E), matching Expert.forward in eval mode.

    compute_dtype: MXU operand dtype for x/W1/W2 (default bf16); accumulation is f32 and
    the output keeps x's dtype.  Pass jnp.float32 for an exact (slower) path.
    """
    orig_shape = x.shape
    out_dtype = x.dtype
    E = orig_shape[-1]
    H = w1.shape[1]

    xm = x.reshape(-1, E)
    M = xm.shape[0]

    cdt = jnp.dtype(compute_dtype)
    itb = cdt.itemsize
    otb = jnp.dtype(out_dtype).itemsize
    direct_out = jnp.dtype(out_dtype) == jnp.dtype(jnp.float32)

    # --- generation-aware defaults / VMEM budget -------------------------------
    vmem_cap = _vmem_capacity_bytes()
    vmem_budget = int(vmem_cap * 0.75)          # ~96 MiB on v5e/v6e, ~48 MiB on v7x
    if block_m is None:
        # Bigger row tiles amortize the W1/W2 weight stream (HBM roofline):
        # ~1024 on 128 MiB VMEM parts (v5e/v6e), ~512 under v7x's 64 MiB.
        block_m = 1024 if vmem_cap > (80 << 20) else 512
    block_m = max(8, (block_m // 8) * 8)
    if block_h is None:
        block_h = 512

    E_pad = _round_up(E, 128)
    H128 = _round_up(H, 128)

    # --- row tile ---------------------------------------------------------------
    row_tiled = M > block_m
    tm = block_m if row_tiled else M            # partial last block handled by cdiv + masking

    # --- hidden-dim chunk (keep a 256-multiple for the 2x256x256 MXU) ------------
    if row_tiled:
        th = min(block_h, H128)
    else:
        # single row tile: weights stream exactly once -> fewer, larger k-steps win
        th = min(H128, max(block_h, 2048))
    if H128 >= 256:
        th = max(256, (th // 256) * 256)
    else:
        th = H128

    def _footprint(tm_, th_):
        h_pad_ = _round_up(H, th_)
        acc = 0 if direct_out else tm_ * E_pad * 4
        return (2 * tm_ * E_pad * itb           # x tile (double buffered)
                + 2 * E_pad * th_ * itb         # W1 column chunk
                + 2 * th_ * E_pad * itb         # W2 row chunk
                + 2 * h_pad_ * 4                # b1 (resident, f32)
                + 2 * E_pad * 4                 # b2 (resident, f32)
                + 2 * tm_ * E_pad * otb         # out tile
                + acc)                          # f32 accumulator (non-f32 outputs only)

    # Budget-driven tile clamping (instead of clamping vmem_limit_bytes).
    while _footprint(tm, th) > vmem_budget:
        if row_tiled and tm > 256:
            tm = max(256, _round_up(tm // 2, 8))
        elif th > 256:
            th = max(256, (th // 2) // 256 * 256)
        elif th > 128:
            th = 128
        elif row_tiled and tm > 128:
            tm = 128
        else:
            break

    H_pad = _round_up(H, th)                    # guarantees th never degrades
    grid_m = pl.cdiv(M, tm)
    grid_k = H_pad // th

    # --- padding (no-ops for standard shapes; zero hidden columns are exact) -----
    if E_pad != E:
        xm = jnp.pad(xm, ((0, 0), (0, E_pad - E)))
        w1 = jnp.pad(w1, ((0, E_pad - E), (0, 0)))
        w2 = jnp.pad(w2, ((0, 0), (0, E_pad - E)))
        b2 = jnp.pad(b2, ((0, E_pad - E),))
    if H_pad != H:
        w1 = jnp.pad(w1, ((0, 0), (0, H_pad - H)))
        b1 = jnp.pad(b1, ((0, H_pad - H),))
        w2 = jnp.pad(w2, ((0, H_pad - H), (0, 0)))

    # Casts are no-ops when weights were prepared once via prepare_expert_params().
    xm = xm.astype(cdt)
    w1 = w1.astype(cdt)
    w2 = w2.astype(cdt)
    b1_2d = b1.astype(jnp.float32).reshape(grid_k, th)   # resident whole, sliced per-k
    b2_2d = b2.astype(jnp.float32).reshape(1, E_pad)

    need = _footprint(tm, th)
    vmem_limit = min(int(need * 1.3) + (4 << 20), int(vmem_cap * 0.9))
    vmem_limit = max(vmem_limit, need + (2 << 20))        # never under-provision

    in_specs = [
        pl.BlockSpec((tm, E_pad), lambda i, k: (i, 0)),   # x row tile (resident across k)
        pl.BlockSpec((E_pad, th), lambda i, k: (0, k)),   # W1 column chunk
        pl.BlockSpec((grid_k, th), lambda i, k: (0, 0)),  # b1, DMA'd once
        pl.BlockSpec((th, E_pad), lambda i, k: (k, 0)),   # W2 row chunk
        pl.BlockSpec((1, E_pad), lambda i, k: (0, 0)),    # b2, DMA'd once
    ]
    out_spec = pl.BlockSpec((tm, E_pad), lambda i, k: (i, 0))

    kernel = _expert_kernel_direct if direct_out else _expert_kernel_scratch
    scratch = () if direct_out else (pltpu.VMEM((tm, E_pad), jnp.float32),)

    out = pl.pallas_call(
        kernel,
        out_shape=jax.ShapeDtypeStruct((M, E_pad), out_dtype),
        grid_spec=pltpu.PrefetchScalarGridSpec(
            num_scalar_prefetch=0,
            grid=(grid_m, grid_k),
            in_specs=in_specs,
            out_specs=out_spec,
            scratch_shapes=scratch,
        ),
        compiler_params=pltpu.CompilerParams(
            dimension_semantics=("parallel", "arbitrary"),
            vmem_limit_bytes=vmem_limit,
        ),
    )(xm, w1, b1_2d, w2, b2_2d)

    if E_pad != E:
        out = out[:, :E]
    return out.reshape(orig_shape)


def prepare_expert_params(w1, b1, w2, b2, compute_dtype=jnp.bfloat16):
    """Hoist the per-forward weight cast out of the hot path (do this once at init)."""
    return (jnp.asarray(w1, compute_dtype), jnp.asarray(b1, jnp.float32),
            jnp.asarray(w2, compute_dtype), jnp.asarray(b2, jnp.float32))


def init_expert_params(key, embedding_dim, dtype=jnp.float32):
    """Deterministic init mimicking nn.Linear (uniform in +/- 1/sqrt(fan_in))."""
    E = embedding_dim
    H = 4 * E
    k1, k2, k3, k4 = jax.random.split(key, 4)
    lim1 = 1.0 / (E ** 0.5)
    lim2 = 1.0 / (H ** 0.5)
    # stored pre-transposed: (in, out)
    w1 = jax.random.uniform(k1, (E, H), dtype, -lim1, lim1)
    b1 = jax.random.uniform(k2, (H,), dtype, -lim1, lim1)
    w2 = jax.random.uniform(k3, (H, E), dtype, -lim2, lim2)
    b2 = jax.random.uniform(k4, (E,), dtype, -lim2, lim2)
    return w1, b1, w2, b2


if __name__ == "__main__":
    key = jax.random.PRNGKey(0)
    kx, kp = jax.random.split(key)

    batch, seq, embedding_dim = 2, 8, 32
    x = jax.random.normal(kx, (batch, seq, embedding_dim), dtype=jnp.float32)
    w1, b1, w2, b2 = init_expert_params(kp, embedding_dim)

    ref = jnp.maximum(x.reshape(-1, embedding_dim) @ w1 + b1, 0.0) @ w2 + b2
    ref = ref.reshape(x.shape)

    # Exact path (f32 MXU operands) for the reference check.
    out_f32 = expert_forward(x, w1, b1, w2, b2, compute_dtype=jnp.float32)
    out_f32 = jax.block_until_ready(out_f32)
    assert out_f32.shape == x.shape
    assert jnp.allclose(out_f32, ref, atol=1e-4, rtol=1e-4), "mismatch vs reference (f32)"

    # Default fast path: bf16 MXU operands, f32 accumulation, weights pre-cast once.
    pw1, pb1, pw2, pb2 = prepare_expert_params(w1, b1, w2, b2)
    out_bf16 = expert_forward(x, pw1, pb1, pw2, pb2)
    out_bf16 = jax.block_until_ready(out_bf16)
    assert out_bf16.shape == x.shape
    assert jnp.allclose(out_bf16, ref, atol=1e-1, rtol=1e-1), "mismatch vs reference (bf16)"

    print("KERNEL_OK")
</pallas_src>

<mosaic_0001>
module attributes {stable_mosaic.version = 11 : i64} {
  func.func @_expert_kernel_direct(%arg0: i32, %arg1: i32, %arg2: memref<16x128xf32, #tpu.memory_space<vmem>>, %arg3: memref<128x128xf32, #tpu.memory_space<vmem>>, %arg4: memref<1x128xf32, #tpu.memory_space<vmem>>, %arg5: memref<128x128xf32, #tpu.memory_space<vmem>>, %arg6: memref<1x128xf32, #tpu.memory_space<vmem>>, %arg7: memref<16x128xf32, #tpu.memory_space<vmem>>) attributes {dimension_semantics = [#tpu.dimension_semantics<parallel>, #tpu.dimension_semantics<arbitrary>], iteration_bounds = array<i64: 1, 1>, scalar_prefetch = 0 : i64, scratch_operands = 0 : i64, tpu.core_type = #tpu.core_type<tc>, window_params = [{transform_indices = @transform_0, window_bounds = array<i64: 16, 128>}, {transform_indices = @transform_1, window_bounds = array<i64: 128, 128>}, {pipeline_mode = #tpu.pipeline_mode<synchronous>, transform_indices = @transform_2, window_bounds = array<i64: 1, 128>}, {transform_indices = @transform_3, window_bounds = array<i64: 128, 128>}, {pipeline_mode = #tpu.pipeline_mode<synchronous>, transform_indices = @transform_4, window_bounds = array<i64: 1, 128>}, {transform_indices = @transform_5, window_bounds = array<i64: 16, 128>}]} {
    %c0_i32 = arith.constant 0 : i32
    %0 = arith.cmpi eq, %arg1, %c0_i32 : i32
    %1 = arith.extui %0 : i1 to i32
    %c0_i32_0 = arith.constant 0 : i32
    %2 = arith.cmpi ne, %1, %c0_i32_0 : i32
    scf.if %2 {
      %cst_15 = arith.constant 0.000000e+00 : f32
      %20 = vector.broadcast %cst_15 : f32 to vector<16x128xf32>
      %c0_16 = arith.constant 0 : index
      %c0_17 = arith.constant 0 : index
      %21 = vector.load %arg7[%c0_16, %c0_17] : memref<16x128xf32, #tpu.memory_space<vmem>>, vector<16x128xf32>
      tpu.vector_store %arg7[%c0_16, %c0_17], %20 {strides = array<i32>} : memref<16x128xf32, #tpu.memory_space<vmem>>, vector<16x128xf32>,
    } else {
    }
    %c0 = arith.constant 0 : index
    %c0_1 = arith.constant 0 : index
    %3 = vector.load %arg7[%c0, %c0_1] : memref<16x128xf32, #tpu.memory_space<vmem>>, vector<16x128xf32>
    %c0_2 = arith.constant 0 : index
    %c0_3 = arith.constant 0 : index
    %4 = vector.load %arg2[%c0_2, %c0_3] : memref<16x128xf32, #tpu.memory_space<vmem>>, vector<16x128xf32>
    %c0_4 = arith.constant 0 : index
    %c0_5 = arith.constant 0 : index
    %5 = vector.load %arg3[%c0_4, %c0_5] : memref<128x128xf32, #tpu.memory_space<vmem>>, vector<128x128xf32>
    %cst = arith.constant dense<0.000000e+00> : vector<16x128xf32>
    %6 = tpu.matmul %4, %5, %cst {dimension_numbers = #tpu.dot_dimension_numbers<[1], [0], [0], [1], [0, 0, 1, 1], [], []>} : vector<16x128xf32>, vector<128x128xf32>, vector<16x128xf32> -> vector<16x128xf32>
    %7 = arith.index_cast %arg1 : i32 to index
    %c0_6 = arith.constant 0 : index
    %8 = vector.load %arg4[%7, %c0_6] : memref<1x128xf32, #tpu.memory_space<vmem>>, vector<1x128xf32>
    %9 = vector.broadcast %8 : vector<1x128xf32> to vector<16x128xf32>
    %10 = arith.addf %6, %9 : vector<16x128xf32>
    %cst_7 = arith.constant 0.000000e+00 : f32
    %11 = vector.broadcast %cst_7 : f32 to vector<16x128xf32>
    %12 = arith.maximumf %10, %11 : vector<16x128xf32>
    %c0_8 = arith.constant 0 : index
    %c0_9 = arith.constant 0 : index
    %13 = vector.load %arg5[%c0_8, %c0_9] : memref<128x128xf32, #tpu.memory_space<vmem>>, vector<128x128xf32>
    %cst_10 = arith.constant dense<0.000000e+00> : vector<16x128xf32>
    %14 = tpu.matmul %12, %13, %cst_10 {dimension_numbers = #tpu.dot_dimension_numbers<[1], [0], [0], [1], [0, 0, 1, 1], [], []>} : vector<16x128xf32>, vector<128x128xf32>, vector<16x128xf32> -> vector<16x128xf32>
    %15 = arith.addf %3, %14 : vector<16x128xf32>
    %c0_11 = arith.constant 0 : index
    %c0_12 = arith.constant 0 : index
    %16 = vector.load %arg7[%c0_11, %c0_12] : memref<16x128xf32, #tpu.memory_space<vmem>>, vector<16x128xf32>
    tpu.vector_store %arg7[%c0_11, %c0_12], %15 {strides = array<i32>} : memref<16x128xf32, #tpu.memory_space<vmem>>, vector<16x128xf32>,
    %c0_i32_13 = arith.constant 0 : i32
    %17 = arith.cmpi eq, %arg1, %c0_i32_13 : i32
    %18 = arith.extui %17 : i1 to i32
    %c0_i32_14 = arith.constant 0 : i32
    %19 = arith.cmpi ne, %18, %c0_i32_14 : i32
    scf.if %19 {
      %c0_15 = arith.constant 0 : index
      %c0_16 = arith.constant 0 : index
      %20 = vector.load %arg7[%c0_15, %c0_16] : memref<16x128xf32, #tpu.memory_space<vmem>>, vector<16x128xf32>
      %c0_17 = arith.constant 0 : index
      %c0_18 = arith.constant 0 : index
      %21 = vector.load %arg6[%c0_17, %c0_18] : memref<1x128xf32, #tpu.memory_space<vmem>>, vector<1x128xf32>
      %22 = vector.broadcast %21 : vector<1x128xf32> to vector<16x128xf32>
      %23 = arith.addf %20, %22 : vector<16x128xf32>
      %c0_19 = arith.constant 0 : index
      %c0_20 = arith.constant 0 : index
      %24 = vector.load %arg7[%c0_19, %c0_20] : memref<16x128xf32, #tpu.memory_space<vmem>>, vector<16x128xf32>
      tpu.vector_store %arg7[%c0_19, %c0_20], %23 {strides = array<i32>} : memref<16x128xf32, #tpu.memory_space<vmem>>, vector<16x128xf32>,
    } else {
    }
    return
  }
  func.func @transform_0(%arg0: i32, %arg1: i32) -> (i32, i32) {
    %c0_i32 = arith.constant 0 : i32
    %c0_i32_0 = arith.constant 0 : i32
    return %arg0, %c0_i32 : i32, i32
  }
  func.func @transform_1(%arg0: i32, %arg1: i32) -> (i32, i32) {
    %c0_i32 = arith.constant 0 : i32
    %c0_i32_0 = arith.constant 0 : i32
    return %c0_i32, %arg1 : i32, i32
  }
  func.func @transform_2(%arg0: i32, %arg1: i32) -> (i32, i32) {
    %c0_i32 = arith.constant 0 : i32
    %c0_i32_0 = arith.constant 0 : i32
    %c0_i32_1 = arith.constant 0 : i32
    return %c0_i32, %c0_i32_0 : i32, i32
  }
  func.func @transform_3(%arg0: i32, %arg1: i32) -> (i32, i32) {
    %c0_i32 = arith.constant 0 : i32
    %c0_i32_0 = arith.constant 0 : i32
    return %arg1, %c0_i32 : i32, i32
  }
  func.func @transform_4(%arg0: i32, %arg1: i32) -> (i32, i32) {
    %c0_i32 = arith.constant 0 : i32
    %c0_i32_0 = arith.constant 0 : i32
    %c0_i32_1 = arith.constant 0 : i32
    return %c0_i32, %c0_i32_0 : i32, i32
  }
  func.func @transform_5(%arg0: i32, %arg1: i32) -> (i32, i32) {
    %c0_i32 = arith.constant 0 : i32
    %c0_i32_0 = arith.constant 0 : i32
    return %arg0, %c0_i32 : i32, i32
  }
}

</mosaic_0001>

<bundles_post_ra>
// kernel: expert_forward.1
= control target key start
LH: loop header
LB: loop body
LE: loop exit
PB: predicated region body
PF: predicated region fallthrough
CT: control target
= control target key end

     0   :  { %s562_s1 = inlined_call_operand.vmem [shape: f32[128,128], index: 1, kind: input, shape index: {}]   ;;  %s563_s0 = inlined_call_operand.vmem [shape: f32[16,128], index: 0, kind: input, shape index: {}]   ;;  %s564_s3 = inlined_call_operand.vmem [shape: f32[128,128], index: 3, kind: input, shape index: {}]   ;;  %s565_s2 = inlined_call_operand.vmem [shape: f32[1,128], index: 2, kind: input, shape index: {}]   ;;  %s566_s4 = inlined_call_operand.vmem [shape: f32[1,128], index: 4, kind: input, shape index: {}]   ;;  %s567_s5 = inlined_call_operand.vmem [shape: f32[16,128], index: 5, kind: output, shape index: {}]  }
   0x1   :  { %v30_v0 = vld [vmem:[%s562_s1] sm:$0xff]  ;;  %v31_v1 = vld [vmem:[%s562_s1 + $0x8] sm:$0xff]  ;;  %v32_v2 = vld [vmem:[%s562_s1 + $0x10] sm:$0xff] }
   0x2   :  { %v353_v3 = vpack.c.bf16 %v31_v1, %v30_v0  ;;  %v33_v4 = vld [vmem:[%s562_s1 + $0x18] sm:$0xff]  ;;  %v34_v6 = vld [vmem:[%s562_s1 + $0x20] sm:$0xff]  ;;  %v35_v7 = vld [vmem:[%s562_s1 + $0x28] sm:$0xff] }
   0x3   :  { %v357_v5 = vpack.c.bf16 %v33_v4, %v32_v2  ;;  %v361_v8 = vpack.c.bf16 %v35_v7, %v34_v6  ;;  %v36_v9 = vld [vmem:[%s562_s1 + $0x30] sm:$0xff]  ;;  %v37_v10 = vld [vmem:[%s562_s1 + $0x38] sm:$0xff]  ;;  %v28_v11 = vld [vmem:[%s563_s0] sm:$0xff] }
   0x4   :  { %354 = vmatprep.subr.bf16.mxu0 %v353_v3  ;;  %315 = vmatprep.mubr.f32.mxu0 %v28_v11  ;;  %v130_v12 = vld [vmem:[%s564_s3] sm:$0xff]  ;;  %v131_v13 = vld [vmem:[%s564_s3 + $0x8] sm:$0xff]  ;;  %v132_v14 = vld [vmem:[%s564_s3 + $0x10] sm:$0xff]  ;;  %v365_v20 = vpack.c.bf16 %v37_v10, %v36_v9 }
   0x5   :  { %356 = vmatpush3.bf16.msra.mxu0 %v353_v3  ;;  %v385_v15 = vpack.c.bf16 %v131_v13, %v130_v12  ;;  %v133_v16 = vld [vmem:[%s564_s3 + $0x18] sm:$0xff]  ;;  %v134_v18 = vld [vmem:[%s564_s3 + $0x20] sm:$0xff]  ;;  %v135_v19 = vld [vmem:[%s564_s3 + $0x28] sm:$0xff] }
   0x6   :  { %358 = vmatprep.subr.bf16.mxu0 %v357_v5  ;;  %v389_v17 = vpack.c.bf16 %v133_v16, %v132_v14  ;;  %v38_v21 = vld [vmem:[%s562_s1 + $0x40] sm:$0xff]  ;;  %v39_v22 = vld [vmem:[%s562_s1 + $0x48] sm:$0xff]  ;;  %v393_v23 = vpack.c.bf16 %v135_v19, %v134_v18  ;;  %v136_v24 = vld [vmem:[%s564_s3 + $0x30] sm:$0xff] }
   0x7   :  { %386 = vmatprep.subr.bf16.mxu1 %v385_v15  ;;  %v137_v25 = vld [vmem:[%s564_s3 + $0x38] sm:$0xff]  ;;  %v369_v26 = vpack.c.bf16 %v39_v22, %v38_v21  ;;  %v40_v27 = vld [vmem:[%s562_s1 + $0x50] sm:$0xff]  ;;  %v138_v30 = vld [vmem:[%s564_s3 + $0x40] sm:$0xff] }
   0x8   :  { %388 = vmatpush3.bf16.msra.mxu1 %v385_v15  ;;  %v41_v28 = vld [vmem:[%s562_s1 + $0x58] sm:$0xff]  ;;  %v397_v29 = vpack.c.bf16 %v137_v25, %v136_v24  ;;  %v139_v31 = vld [vmem:[%s564_s3 + $0x48] sm:$0xff]  ;;  %v42_v33 = vld [vmem:[%s562_s1 + $0x60] sm:$0xff] }
   0x9   :  { %360 = vmatpush3.bf16.msra.mxu0 %v357_v5  ;;  %390 = vmatprep.subr.bf16.mxu1 %v389_v17  ;;  %v373_v32 = vpack.c.bf16 %v41_v28, %v40_v27  ;;  %v43_v34 = vld [vmem:[%s562_s1 + $0x68] sm:$0xff]  ;;  %v401_v35 = vpack.c.bf16 %v139_v31, %v138_v30  ;;  %v140_v36 = vld [vmem:[%s564_s3 + $0x50] sm:$0xff]  ;;  %v141_v37 = vld [vmem:[%s564_s3 + $0x58] sm:$0xff] }
   0xa   :  { %362 = vmatprep.subr.bf16.mxu0 %v361_v8  ;;  %v377_v38 = vpack.c.bf16 %v43_v34, %v42_v33  ;;  %v44_v39 = vld [vmem:[%s562_s1 + $0x70] sm:$0xff]  ;;  %v45_v40 = vld [vmem:[%s562_s1 + $0x78] sm:$0xff]  ;;  %v405_v41 = vpack.c.bf16 %v141_v37, %v140_v36  ;;  %v142_v42 = vld [vmem:[%s564_s3 + $0x60] sm:$0xff] }
   0xb   :  { %v143_v43 = vld [vmem:[%s564_s3 + $0x68] sm:$0xff]  ;;  %v381_v44 = vpack.c.bf16 %v45_v40, %v44_v39  ;;  %v144_v47 = vld [vmem:[%s564_s3 + $0x70] sm:$0xff]  ;;  %v145_v48 = vld [vmem:[%s564_s3 + $0x78] sm:$0xff] }
   0xc   :  { %392 = vmatpush3.bf16.msra.mxu1 %v389_v17  ;;  %v409_v45 = vpack.c.bf16 %v143_v43, %v142_v42  ;;  %v29_v46 = vld [vmem:[%s563_s0 + $0x8] sm:$0xff]  ;;  %v413_v49 = vpack.c.bf16 %v145_v48, %v144_v47  ;;  %v245_v50 = vld [vmem:[%s565_s2] ss:$0 sm:$0xff] }
   0xd   :  { %364 = vmatpush3.bf16.msra.mxu0 %v361_v8  ;;  %394 = vmatprep.subr.bf16.mxu1 %v393_v23  ;;  %v246_v58 = vld [vmem:[%s566_s4] ss:$0 sm:$0xff] }
   0xe   :  { %366 = vmatprep.subr.bf16.mxu0 %v365_v20 }
  0x10   :  { %396 = vmatpush3.bf16.msra.mxu1 %v393_v23 }
  0x11   :  { %368 = vmatpush3.bf16.msra.mxu0 %v365_v20  ;;  %398 = vmatprep.subr.bf16.mxu1 %v397_v29 }
  0x12   :  { %370 = vmatprep.subr.bf16.mxu0 %v369_v26 }
  0x14   :  { %400 = vmatpush3.bf16.msra.mxu1 %v397_v29 }
  0x15   :  { %372 = vmatpush3.bf16.msra.mxu0 %v369_v26  ;;  %402 = vmatprep.subr.bf16.mxu1 %v401_v35 }
  0x16   :  { %374 = vmatprep.subr.bf16.mxu0 %v373_v32 }
  0x18   :  { %404 = vmatpush3.bf16.msra.mxu1 %v401_v35 }
  0x19   :  { %376 = vmatpush3.bf16.msra.mxu0 %v373_v32  ;;  %406 = vmatprep.subr.bf16.mxu1 %v405_v41 }
  0x1a   :  { %378 = vmatprep.subr.bf16.mxu0 %v377_v38 }
  0x1c   :  { %408 = vmatpush3.bf16.msra.mxu1 %v405_v41 }
  0x1d   :  { %380 = vmatpush3.bf16.msra.mxu0 %v377_v38  ;;  %410 = vmatprep.subr.bf16.mxu1 %v409_v45 }
  0x1e   :  { %382 = vmatprep.subr.bf16.mxu0 %v381_v44 }
  0x20   :  { %412 = vmatpush3.bf16.msra.mxu1 %v409_v45 }
  0x21   :  { %384 = vmatpush3.bf16.msra.mxu0 %v381_v44  ;;  %414 = vmatprep.subr.bf16.mxu1 %v413_v49 }
  0x24   :  { %316 = vmatmul.mubr.f32.vlgmr.msra.gmra.mrb[0].mxu0 %v29_v46  ;;  %416 = vmatpush3.bf16.msra.mxu1 %v413_v49 }
  0xf7   :  { %v317_v51 = vpop.f32.mrb[0].mxu0 }
  0xf8   :  { %v125_v52 = vadd.f32 %v317_v51, %v245_v50  ;;  %v119_v53 = vpop.f32.mrb[1].mxu0 }
  0xf9   :  { %v120_v54 = vadd.f32 %v245_v50, %v119_v53 }
  0xfa   :  { %v129_v56 = vmax.f32 %v125_v52, 0.0 }
  0xfb   :  { %v128_v55 = vmax.f32 %v120_v54, 0.0 }
  0xfd   :  { %350 = vmatprep.mubr.f32.mxu1 %v128_v55 }
  0xfe   :  { %351 = vmatmul.mubr.f32.vlgmr.msra.gmra.mrb[0].mxu1 %v129_v56 }
 0x1d1   :  { %v352_v57 = vpop.f32.mrb[0].mxu1 }
 0x1d2   :  { %v212_v59 = vpop.f32.mrb[1].mxu1  ;;  %v238_v60 = vadd.f32 %v352_v57, %v246_v58 }
 0x1d3   :  { %v237_v61 = vadd.f32 %v246_v58, %v212_v59 }
 0x1d4   :  { %240 = vst [vmem:[%s567_s5 + $0x8] sm:$0xff] %v238_v60 }
 0x1d5   :  { %239 = vst [vmem:[%s567_s5] sm:$0xff] %v237_v61 }

</bundles_post_ra>
